<compile_context>
chip_gen: v6e
topology: v6e:2x2x1
jax: 0.10.0
libtpu: 0.0.40
codegen_flags: <defaults>
</compile_context>

<pallas_src>
import math
from functools import partial

import jax
import jax.numpy as jnp
from jax.experimental import pallas as pl
from jax.experimental.pallas import tpu as pltpu


def _round_up(x, m):
    return ((x + m - 1) // m) * m


def _default_silu_dtype():
    """bf16 SiLU on v6e/v7x (native bf16 VPU/EUP); f32 elsewhere (e.g. v5e)."""
    try:
        kind = jax.devices()[0].device_kind.lower()
    except Exception:
        return jnp.float32
    if any(s in kind for s in ("v6", "v7", "tpu7")):
        return jnp.bfloat16
    return jnp.float32


# ----------------------------------------------------------------------------
# Fused kernel: sinusoidal timestep embedding + 2-layer MLP (SiLU)
# ----------------------------------------------------------------------------
def _make_kernel(silu_dtype):
    def kernel(t_ref, freqs_ref, w1c_ref, w1s_ref, b1_ref, w2_ref, b2_ref, o_ref):
        # ---- sinusoidal frequency embedding (computed in-register, f32) ----
        t = t_ref[...]                       # (tm, 1)    f32
        freqs = freqs_ref[...]               # (1, half)  f32
        args = t * freqs                     # (tm, half) f32 (broadcast)

        mm_dtype = w1c_ref.dtype             # bf16: native MXU path, f32 acc

        # ---- Linear(D -> H) as two accumulating dots against the cos/sin
        #      halves of W1 (avoids materializing the (tm, D) concatenate) ----
        h = jnp.dot(jnp.cos(args).astype(mm_dtype), w1c_ref[...],
                    preferred_element_type=jnp.float32)
        h = h + jnp.dot(jnp.sin(args).astype(mm_dtype), w1s_ref[...],
                        preferred_element_type=jnp.float32)
        h = h + b1_ref[...]                  # bias add in f32

        # ---- SiLU (bf16 on v6e/v7x, f32 on v5e) ----
        h = h.astype(silu_dtype)
        h = h * jax.nn.sigmoid(h)

        # ---- Linear(H -> H) + bias ----
        out = jnp.dot(h.astype(mm_dtype), w2_ref[...],
                      preferred_element_type=jnp.float32)
        out = out + b2_ref[...]

        o_ref[...] = out.astype(o_ref.dtype)

    return kernel


# ----------------------------------------------------------------------------
# One-time parameter preparation (model init, NOT per call)
# ----------------------------------------------------------------------------
def init_timestep_embedder_params(w1, b1, w2, b2, *, max_period=10000.0,
                                  matmul_dtype=jnp.bfloat16):
    """Cast weights to the MXU dtype once, pre-split W1 into cos/sin halves,
    and precompute the frequency table, so the per-call wrapper does zero
    extra HBM passes over the weights."""
    D, H = w1.shape
    assert D % 2 == 0, "odd frequency_embedding_size not supported"
    # TODO(synk): the `dim % 2` zero-pad branch of the PyTorch module is not
    # implemented (frequency_embedding_size is even by default).
    assert w2.shape == (H, H) and b1.shape == (H,) and b2.shape == (H,)
    half = D // 2

    freqs = jnp.exp(
        (-math.log(max_period) / half) * jnp.arange(half, dtype=jnp.float32)
    ).reshape(1, half)

    params = dict(
        freqs=freqs,
        w1_cos=w1[:half].astype(matmul_dtype),
        w1_sin=w1[half:].astype(matmul_dtype),
        b1=b1.reshape(1, H).astype(jnp.float32),
        w2=w2.astype(matmul_dtype),
        b2=b2.reshape(1, H).astype(jnp.float32),
    )
    return jax.tree_util.tree_map(jax.device_put, params)


def _vmem_limit_bytes(tm, half, H, mm_bytes, out_bytes):
    """Footprint-derived VMEM limit, capped per TPU generation."""
    # Resident constants (single-buffered via pl.Buffered(1)).
    resident = (2 * half * H + H * H) * mm_bytes + (half + 2 * H) * 4
    # Streamed tiles (double-buffered); the (tm, 1) f32 t-tile pads to 128 lanes.
    streamed = 2 * (tm * 128 * 4) + 2 * (tm * H * out_bytes)
    # f32 intermediates (args/cos/sin, h, out) — generous upper bound.
    scratch = tm * (3 * half + 3 * H) * 4
    need = resident + streamed + scratch + (4 << 20)   # headroom
    try:
        phys = pltpu.get_tpu_info().vmem_capacity_bytes
    except Exception:
        phys = 128 << 20
    cap = int(phys * 0.78)   # ~100 MiB on 128 MiB chips, ~50 MiB on v7x (64 MiB)
    return max(16 << 20, min(int(need * 1.25), cap))


# ----------------------------------------------------------------------------
# Per-call wrapper
# ----------------------------------------------------------------------------
def timestep_embedder_pallas(t, params, *, tm=128, out_dtype=jnp.float32,
                             silu_dtype=None):
    """t: (N,) timesteps; params: output of init_timestep_embedder_params."""
    freqs = params["freqs"]
    w1c, w1s = params["w1_cos"], params["w1_sin"]
    b1, w2, b2 = params["b1"], params["w2"], params["b2"]

    N = t.shape[0]
    half, H = w1c.shape

    if silu_dtype is None:
        silu_dtype = _default_silu_dtype()

    # Row tile: multiple of 8 (sublane); for N > tm ensure >= 2 grid steps so
    # the "parallel" axis can shard rows across v7x's two TensorCores.
    tm_req = max(8, _round_up(tm, 8))
    if N > tm_req:
        tm_eff = min(tm_req, _round_up((N + 1) // 2, 8))
    else:
        tm_eff = max(8, min(tm_req, _round_up(N, 8)))
    M = _round_up(N, tm_eff)

    # Pad the (tiny) timestep column to the tiled length.
    t_pad = jnp.zeros((M, 1), jnp.float32).at[:N, 0].set(t.astype(jnp.float32))

    # Constant-index operands: single-buffered, resident in VMEM for the grid.
    resident = partial(pl.BlockSpec, pipeline_mode=pl.Buffered(1))

    mm_bytes = jnp.dtype(w1c.dtype).itemsize
    out_bytes = jnp.dtype(out_dtype).itemsize

    grid = (M // tm_eff,)
    out = pl.pallas_call(
        _make_kernel(silu_dtype),
        out_shape=jax.ShapeDtypeStruct((M, H), out_dtype),
        grid_spec=pltpu.PrefetchScalarGridSpec(
            num_scalar_prefetch=0,
            grid=grid,
            in_specs=[
                pl.BlockSpec((tm_eff, 1), lambda i: (i, 0)),   # t tile (streamed)
                resident((1, half), lambda i: (0, 0)),         # freqs
                resident((half, H), lambda i: (0, 0)),         # W1 (cos half)
                resident((half, H), lambda i: (0, 0)),         # W1 (sin half)
                resident((1, H), lambda i: (0, 0)),            # b1
                resident((H, H), lambda i: (0, 0)),            # W2
                resident((1, H), lambda i: (0, 0)),            # b2
            ],
            out_specs=pl.BlockSpec((tm_eff, H), lambda i: (i, 0)),
        ),
        compiler_params=pltpu.CompilerParams(
            dimension_semantics=("parallel",),
            vmem_limit_bytes=_vmem_limit_bytes(tm_eff, half, H, mm_bytes,
                                               out_bytes),
        ),
    )(t_pad, freqs, w1c, w1s, b1, w2, b2)
    return out[:N]


# ----------------------------------------------------------------------------
# Pure-JAX reference mirroring the PyTorch module (same matmul dtype policy)
# ----------------------------------------------------------------------------
def timestep_embedder_ref(t, w1, b1, w2, b2, freq_dim, max_period, matmul_dtype):
    half = freq_dim // 2
    freqs = jnp.exp(-math.log(max_period)
                    * jnp.arange(half, dtype=jnp.float32) / half)
    args = t[:, None].astype(jnp.float32) * freqs[None, :]
    emb = jnp.concatenate([jnp.cos(args), jnp.sin(args)], axis=-1)
    h = jnp.dot(emb.astype(matmul_dtype), w1.astype(matmul_dtype),
                preferred_element_type=jnp.float32) + b1
    h = h * jax.nn.sigmoid(h)
    out = jnp.dot(h.astype(matmul_dtype), w2.astype(matmul_dtype),
                  preferred_element_type=jnp.float32) + b2
    return out


if __name__ == "__main__":
    # Small shapes consistent with the module: batch of 2 scalar timesteps,
    # frequency_embedding_size = 256 (module default), hidden_size = 128
    # (multiple of 128 so the kernel output is lane-dense).
    hidden_size = 128
    freq_dim = 256
    N = 2

    key = jax.random.PRNGKey(0)
    kt, k1, kb1, k2, kb2 = jax.random.split(key, 5)

    t = jax.random.uniform(kt, (N,), dtype=jnp.float32, minval=0.0, maxval=1000.0)
    w1 = jax.random.normal(k1, (freq_dim, hidden_size), dtype=jnp.float32) * 0.02
    b1 = jax.random.normal(kb1, (hidden_size,), dtype=jnp.float32) * 0.02
    w2 = jax.random.normal(k2, (hidden_size, hidden_size), dtype=jnp.float32) * 0.02
    b2 = jax.random.normal(kb2, (hidden_size,), dtype=jnp.float32) * 0.02

    # One-time weight prep (bf16 cast, W1 split, freq table) — NOT per call.
    params = init_timestep_embedder_params(w1, b1, w2, b2,
                                           matmul_dtype=jnp.bfloat16)

    out = timestep_embedder_pallas(t, params, tm=128)
    out = jax.block_until_ready(out)

    ref = timestep_embedder_ref(t, w1, b1, w2, b2, freq_dim, 10000.0, jnp.bfloat16)

    assert out.shape == (N, hidden_size)
    assert jnp.allclose(out, ref, atol=2e-2, rtol=2e-2), "mismatch vs reference"
    print("KERNEL_OK")
</pallas_src>

<mosaic_0001>
module attributes {stable_mosaic.version = 11 : i64} {
  func.func @kernel(%arg0: i32, %arg1: memref<8x1xf32, #tpu.memory_space<vmem>>, %arg2: memref<1x128xf32, #tpu.memory_space<vmem>>, %arg3: memref<128x128xbf16, #tpu.memory_space<vmem>>, %arg4: memref<128x128xbf16, #tpu.memory_space<vmem>>, %arg5: memref<1x128xf32, #tpu.memory_space<vmem>>, %arg6: memref<128x128xbf16, #tpu.memory_space<vmem>>, %arg7: memref<1x128xf32, #tpu.memory_space<vmem>>, %arg8: memref<8x128xf32, #tpu.memory_space<vmem>>) attributes {dimension_semantics = [#tpu.dimension_semantics<parallel>], iteration_bounds = array<i64: 1>, scalar_prefetch = 0 : i64, scratch_operands = 0 : i64, tpu.core_type = #tpu.core_type<tc>, window_params = [{transform_indices = @transform_0, window_bounds = array<i64: 8, 1>}, {pipeline_mode = #tpu.pipeline_mode<synchronous>, transform_indices = @transform_1, window_bounds = array<i64: 1, 128>}, {pipeline_mode = #tpu.pipeline_mode<synchronous>, transform_indices = @transform_2, window_bounds = array<i64: 128, 128>}, {pipeline_mode = #tpu.pipeline_mode<synchronous>, transform_indices = @transform_3, window_bounds = array<i64: 128, 128>}, {pipeline_mode = #tpu.pipeline_mode<synchronous>, transform_indices = @transform_4, window_bounds = array<i64: 1, 128>}, {pipeline_mode = #tpu.pipeline_mode<synchronous>, transform_indices = @transform_5, window_bounds = array<i64: 128, 128>}, {pipeline_mode = #tpu.pipeline_mode<synchronous>, transform_indices = @transform_6, window_bounds = array<i64: 1, 128>}, {transform_indices = @transform_7, window_bounds = array<i64: 8, 128>}]} {
    %c0 = arith.constant 0 : index
    %c0_0 = arith.constant 0 : index
    %0 = vector.load %arg1[%c0, %c0_0] : memref<8x1xf32, #tpu.memory_space<vmem>>, vector<8x1xf32>
    %c0_1 = arith.constant 0 : index
    %c0_2 = arith.constant 0 : index
    %1 = vector.load %arg2[%c0_1, %c0_2] : memref<1x128xf32, #tpu.memory_space<vmem>>, vector<1x128xf32>
    %2 = vector.broadcast %0 : vector<8x1xf32> to vector<8x128xf32>
    %3 = vector.broadcast %1 : vector<1x128xf32> to vector<8x128xf32>
    %4 = arith.mulf %2, %3 : vector<8x128xf32>
    %5 = math.cos %4 : vector<8x128xf32>
    %6 = arith.truncf %5 : vector<8x128xf32> to vector<8x128xbf16>
    %c0_3 = arith.constant 0 : index
    %c0_4 = arith.constant 0 : index
    %7 = vector.load %arg3[%c0_3, %c0_4] : memref<128x128xbf16, #tpu.memory_space<vmem>>, vector<128x128xbf16>
    %cst = arith.constant dense<0.000000e+00> : vector<8x128xf32>
    %8 = tpu.matmul %6, %7, %cst {dimension_numbers = #tpu.dot_dimension_numbers<[1], [0], [0], [1], [0, 0, 1, 1], [], []>} : vector<8x128xbf16>, vector<128x128xbf16>, vector<8x128xf32> -> vector<8x128xf32>
    %9 = math.sin %4 : vector<8x128xf32>
    %10 = arith.truncf %9 : vector<8x128xf32> to vector<8x128xbf16>
    %c0_5 = arith.constant 0 : index
    %c0_6 = arith.constant 0 : index
    %11 = vector.load %arg4[%c0_5, %c0_6] : memref<128x128xbf16, #tpu.memory_space<vmem>>, vector<128x128xbf16>
    %cst_7 = arith.constant dense<0.000000e+00> : vector<8x128xf32>
    %12 = tpu.matmul %10, %11, %cst_7 {dimension_numbers = #tpu.dot_dimension_numbers<[1], [0], [0], [1], [0, 0, 1, 1], [], []>} : vector<8x128xbf16>, vector<128x128xbf16>, vector<8x128xf32> -> vector<8x128xf32>
    %13 = arith.addf %8, %12 : vector<8x128xf32>
    %c0_8 = arith.constant 0 : index
    %c0_9 = arith.constant 0 : index
    %14 = vector.load %arg5[%c0_8, %c0_9] : memref<1x128xf32, #tpu.memory_space<vmem>>, vector<1x128xf32>
    %15 = vector.broadcast %14 : vector<1x128xf32> to vector<8x128xf32>
    %16 = arith.addf %13, %15 : vector<8x128xf32>
    %17 = arith.negf %16 : vector<8x128xf32>
    %18 = math.exp %17 : vector<8x128xf32>
    %cst_10 = arith.constant 1.000000e+00 : f32
    %19 = vector.broadcast %cst_10 : f32 to vector<8x128xf32>
    %20 = arith.addf %19, %18 : vector<8x128xf32>
    %21 = arith.divf %19, %20 : vector<8x128xf32>
    %22 = arith.mulf %16, %21 : vector<8x128xf32>
    %23 = arith.truncf %22 : vector<8x128xf32> to vector<8x128xbf16>
    %c0_11 = arith.constant 0 : index
    %c0_12 = arith.constant 0 : index
    %24 = vector.load %arg6[%c0_11, %c0_12] : memref<128x128xbf16, #tpu.memory_space<vmem>>, vector<128x128xbf16>
    %cst_13 = arith.constant dense<0.000000e+00> : vector<8x128xf32>
    %25 = tpu.matmul %23, %24, %cst_13 {dimension_numbers = #tpu.dot_dimension_numbers<[1], [0], [0], [1], [0, 0, 1, 1], [], []>} : vector<8x128xbf16>, vector<128x128xbf16>, vector<8x128xf32> -> vector<8x128xf32>
    %c0_14 = arith.constant 0 : index
    %c0_15 = arith.constant 0 : index
    %26 = vector.load %arg7[%c0_14, %c0_15] : memref<1x128xf32, #tpu.memory_space<vmem>>, vector<1x128xf32>
    %27 = vector.broadcast %26 : vector<1x128xf32> to vector<8x128xf32>
    %28 = arith.addf %25, %27 : vector<8x128xf32>
    %c0_16 = arith.constant 0 : index
    %c0_17 = arith.constant 0 : index
    %29 = vector.load %arg8[%c0_16, %c0_17] : memref<8x128xf32, #tpu.memory_space<vmem>>, vector<8x128xf32>
    tpu.vector_store %arg8[%c0_16, %c0_17], %28 {strides = array<i32>} : memref<8x128xf32, #tpu.memory_space<vmem>>, vector<8x128xf32>,
    return
  }
  func.func @transform_0(%arg0: i32) -> (i32, i32) {
    %c0_i32 = arith.constant 0 : i32
    %c0_i32_0 = arith.constant 0 : i32
    return %arg0, %c0_i32 : i32, i32
  }
  func.func @transform_1(%arg0: i32) -> (i32, i32) {
    %c0_i32 = arith.constant 0 : i32
    %c0_i32_0 = arith.constant 0 : i32
    %c0_i32_1 = arith.constant 0 : i32
    return %c0_i32, %c0_i32_0 : i32, i32
  }
  func.func @transform_2(%arg0: i32) -> (i32, i32) {
    %c0_i32 = arith.constant 0 : i32
    %c0_i32_0 = arith.constant 0 : i32
    %c0_i32_1 = arith.constant 0 : i32
    return %c0_i32, %c0_i32_0 : i32, i32
  }
  func.func @transform_3(%arg0: i32) -> (i32, i32) {
    %c0_i32 = arith.constant 0 : i32
    %c0_i32_0 = arith.constant 0 : i32
    %c0_i32_1 = arith.constant 0 : i32
    return %c0_i32, %c0_i32_0 : i32, i32
  }
  func.func @transform_4(%arg0: i32) -> (i32, i32) {
    %c0_i32 = arith.constant 0 : i32
    %c0_i32_0 = arith.constant 0 : i32
    %c0_i32_1 = arith.constant 0 : i32
    return %c0_i32, %c0_i32_0 : i32, i32
  }
  func.func @transform_5(%arg0: i32) -> (i32, i32) {
    %c0_i32 = arith.constant 0 : i32
    %c0_i32_0 = arith.constant 0 : i32
    %c0_i32_1 = arith.constant 0 : i32
    return %c0_i32, %c0_i32_0 : i32, i32
  }
  func.func @transform_6(%arg0: i32) -> (i32, i32) {
    %c0_i32 = arith.constant 0 : i32
    %c0_i32_0 = arith.constant 0 : i32
    %c0_i32_1 = arith.constant 0 : i32
    return %c0_i32, %c0_i32_0 : i32, i32
  }
  func.func @transform_7(%arg0: i32) -> (i32, i32) {
    %c0_i32 = arith.constant 0 : i32
    %c0_i32_0 = arith.constant 0 : i32
    return %arg0, %c0_i32 : i32, i32
  }
}

</mosaic_0001>

<bundles_post_ra>
// kernel: tpu_custom_call.1
= control target key start
LH: loop header
LB: loop body
LE: loop exit
PB: predicated region body
PF: predicated region fallthrough
CT: control target
= control target key end

     0   :  { %12 = vsyncpa [#allocation3], 0  ;;  %s1035_s0 = inlined_call_operand.vmem [shape: f32[8,1], index: 0, kind: input, shape index: {}]   ;;  %s1036_s1 = inlined_call_operand.vmem [shape: f32[1,128], index: 1, kind: input, shape index: {}]   ;;  %s1037_s2 = inlined_call_operand.hbm [shape: bf16[128,128], index: 2, kind: input, shape index: {}]   ;;  %s1038_s3 = inlined_call_operand.hbm [shape: bf16[128,128], index: 3, kind: input, shape index: {}]   ;;  %s1039_s4 = inlined_call_operand.vmem [shape: f32[1,128], index: 4, kind: input, shape index: {}]   ;;  %s1040_s5 = inlined_call_operand.hbm [shape: bf16[128,128], index: 5, kind: input, shape index: {}]   ;;  %s1041_s6 = inlined_call_operand.vmem [shape: f32[1,128], index: 6, kind: input, shape index: {}]   ;;  %s1042_s7 = inlined_call_operand.hbm [shape: f32[8,128], index: 7, kind: output, shape index: {}]  }
   0x1   :  { %13 = vsyncpa [#allocation6], 0 }
   0x2   :  { %14 = vsyncpa [#allocation4], 0  ;;  %s905_s24 = smov [#allocation5]   ;;  %s906_s26 = smov [#allocation2]  }
   0x3   :  { %s36_s25 = sshll.u32 %s905_s24, 4  ;;  %s24_s27 = sshll.u32 %s906_s26, 4  ;;  %s37_s25 = int_to_ptr.vmem [resolvable:$true] %s36_s25  ;;  %s25_s27 = int_to_ptr.vmem [resolvable:$true] %s24_s27 }
   0x4   :  { %s827_s28 = scalar_lea.vmem %s37_s25, 1024  ;;  %p832_p1 = scmp.lt.s32.totalorder %s37_s25, %s37_s25 }
   0x5   :  { %p828_p0 = scmp.ne.s32.totalorder %s37_s25, %s827_s28  ;;  %p833_p2 = scmp.lt.s32.totalorder %s827_s28, %s827_s28 }
   0x7   :  { %p834_p3 = por %p833_p2, %p832_p1 }
   0x9   :  { %p835_p4 = pnand %p834_p3, %p828_p0 }
   0xb   :  { %838 = shalt.err (!%p835_p4)
}
   0xc   :  { %s907_s29 = smov 64   ;;  %s908_s30 = smov 4  }
   0xd   :  { %42 = dma.hbm_to_vmem [thread:$0]  %s1038_s3, 1024, %s37_s25, [#allocation6], %s907_s29, %s907_s29, %s908_s30  }
   0xe   :  { %s847_s10 = scalar_lea.vmem %s25_s27, 1024  ;;  %p852_p6 = scmp.lt.s32.totalorder %s25_s27, %s25_s27 }
   0xf   :  { %p848_p5 = scmp.ne.s32.totalorder %s25_s27, %s847_s10  ;;  %p853_p7 = scmp.lt.s32.totalorder %s847_s10, %s847_s10 }
  0x11   :  { %p854_p8 = por %p853_p7, %p852_p6 }
  0x13   :  { %p855_p9 = pnand %p854_p8, %p848_p5 }
  0x15   :  { %858 = shalt.err (!%p855_p9)
}
  0x16   :  { %30 = dma.hbm_to_vmem [thread:$0]  %s1037_s2, 1024, %s25_s27, [#allocation3], %s907_s29, %s907_s29, %s908_s30  }
  0x17   :  { %s909_s13 = smov [#allocation7]  }
  0x18   :  { %s50_s14 = sshll.u32 %s909_s13, 4  ;;  %s51_s14 = int_to_ptr.vmem [resolvable:$true] %s50_s14 }
  0x19   :  { %s867_s15 = scalar_lea.vmem %s51_s14, 1024  ;;  %p872_p11 = scmp.lt.s32.totalorder %s51_s14, %s51_s14 }
  0x1a   :  { %p868_p10 = scmp.ne.s32.totalorder %s51_s14, %s867_s15  ;;  %p873_p12 = scmp.lt.s32.totalorder %s867_s15, %s867_s15 }
  0x1c   :  { %p874_p13 = por %p873_p12, %p872_p11 }
  0x1e   :  { %p875_p0 = pnand %p874_p13, %p868_p10 }
  0x20   :  { %878 = shalt.err (!%p875_p0)
}
  0x21   :  { %56 = dma.hbm_to_vmem [thread:$0]  %s1040_s5, 1024, %s51_s14, [#allocation6], %s907_s29, %s907_s29, %s908_s30  }
  0x22   :  { %899 = dma.done.wait [#allocation3], 1024  }
  0x23   :  { %900 = vsyncadd [#allocation3], 4294966272 }
  0x24   :  { %901 = dma.done.wait [#allocation6], 2048  }
  0x25   :  { %902 = vsyncadd [#allocation6], 4294965248  ;;  %v910_v0 = vmov 0   ;;  %v69_v1 = vld [vmem:[%s1035_s0] sm:$0xff]  ;;  %v787_v2 = vld [vmem:[#allocation5 + $0x38] sm:$0xff]   ;;  %v911_v4 = vmov 0.0  }
  0x26   :  { %786 = vset.pattern.permute.xlu0 %v910_v0  ;;  %v788_v3 = vld [vmem:[#allocation2 + $0x38] sm:$0xff]   ;;  %707 = vmatprep.subr.bf16.mxu0 %v911_v4  ;;  %v789_v5 = vld [vmem:[#allocation5 + $0x30] sm:$0xff]   ;;  %v791_v7 = vld [vmem:[#allocation5 + $0x28] sm:$0xff]   ;;  %vm912_vm0 = vmmov 0   ;;  %v913_v32 = vmov 683565275  }
  0x27   :  { %73 = vperm.xlu0 %786, %v69_v1   ;;  %727 = vmatprep.subr.bf16.mxu1 %v911_v4  ;;  %v790_v6 = vld [vmem:[#allocation2 + $0x30] sm:$0xff]   ;;  %v792_v8 = vld [vmem:[#allocation2 + $0x28] sm:$0xff]   ;;  %v793_v9 = vld [vmem:[#allocation5 + $0x20] sm:$0xff]   ;;  %v914_v34 = vmov 2475754826  }
  0x28   :  { %708 = vmatpush3.bf16.msra.mxu0 %v787_v2  ;;  %728 = vmatpush3.bf16.msra.mxu1 %v788_v3  ;;  %v794_v10 = vld [vmem:[#allocation2 + $0x20] sm:$0xff]   ;;  %v795_v11 = vld [vmem:[#allocation5 + $0x18] sm:$0xff]   ;;  %v797_v13 = vld [vmem:[#allocation5 + $0x10] sm:$0xff]   ;;  %v915_v37 = vmov 2131351028  }
  0x29   :  { %709 = vmatprep.subr.bf16.mxu0 %v911_v4  ;;  %729 = vmatprep.subr.bf16.mxu1 %v911_v4  ;;  %v796_v12 = vld [vmem:[#allocation2 + $0x18] sm:$0xff]   ;;  %v798_v14 = vld [vmem:[#allocation2 + $0x10] sm:$0xff]   ;;  %v799_v15 = vld [vmem:[#allocation5 + $0x8] sm:$0xff]   ;;  %v916_v40 = vmov 2102212464  }
  0x2a   :  { %723 = vmatprep.mubr.msk.bf16.mxu0 %vm912_vm0, %v911_v4  ;;  %743 = vmatprep.mubr.msk.bf16.mxu1 %vm912_vm0, %v911_v4  ;;  %v800_v16 = vld [vmem:[#allocation2 + $0x8] sm:$0xff]   ;;  %v801_v17 = vld [vmem:[#allocation5] sm:$0xff]   ;;  %v917_v43 = vmov 920167782   ;;  %v918_v46 = vmov 1326507024  }
  0x2b   :  { %v802_v18 = vld [vmem:[#allocation2] sm:$0xff]  }
  0x2c   :  { %710 = vmatpush3.bf16.msra.mxu0 %v789_v5  ;;  %730 = vmatpush3.bf16.msra.mxu1 %v790_v6  ;;  %v644_v19 = vld [vmem:[%s1036_s1] ss:$0 sm:$0xff] }
  0x2d   :  { %711 = vmatprep.subr.bf16.mxu0 %v911_v4  ;;  %731 = vmatprep.subr.bf16.mxu1 %v911_v4 }
  0x30   :  { %712 = vmatpush3.bf16.msra.mxu0 %v791_v7  ;;  %732 = vmatpush3.bf16.msra.mxu1 %v792_v8 }
  0x31   :  { %713 = vmatprep.subr.bf16.mxu0 %v911_v4  ;;  %733 = vmatprep.subr.bf16.mxu1 %v911_v4 }
  0x34   :  { %714 = vmatpush3.bf16.msra.mxu0 %v793_v9  ;;  %734 = vmatpush3.bf16.msra.mxu1 %v794_v10 }
  0x35   :  { %715 = vmatprep.subr.bf16.mxu0 %v911_v4  ;;  %735 = vmatprep.subr.bf16.mxu1 %v911_v4 }
  0x38   :  { %716 = vmatpush3.bf16.msra.mxu0 %v795_v11  ;;  %736 = vmatpush3.bf16.msra.mxu1 %v796_v12 }
  0x39   :  { %717 = vmatprep.subr.bf16.mxu0 %v911_v4  ;;  %737 = vmatprep.subr.bf16.mxu1 %v911_v4 }
  0x3c   :  { %718 = vmatpush3.bf16.msra.mxu0 %v797_v13  ;;  %738 = vmatpush3.bf16.msra.mxu1 %v798_v14 }
  0x3d   :  { %719 = vmatprep.subr.bf16.mxu0 %v911_v4  ;;  %739 = vmatprep.subr.bf16.mxu1 %v911_v4 }
  0x40   :  { %720 = vmatpush3.bf16.msra.mxu0 %v799_v15  ;;  %740 = vmatpush3.bf16.msra.mxu1 %v800_v16 }
  0x41   :  { %721 = vmatprep.subr.bf16.mxu0 %v911_v4  ;;  %741 = vmatprep.subr.bf16.mxu1 %v911_v4 }
  0x44   :  { %722 = vmatpush3.bf16.msra.mxu0 %v801_v17  ;;  %742 = vmatpush3.bf16.msra.mxu1 %v802_v18 }
  0x45   :  { %747 = vmatprep.subr.bf16.mxu0 %v911_v4 }
  0xa2   :  { %v74_v20 = vpop.permute.xlu0 %73 }
  0xa3   :  { %v996_v21 = vmul.f32 %v644_v19, %v74_v20 }
  0xa5   :  { %v86_v22 = vand.u32 2139095040, %v996_v21  ;;  %v83_v26 = vand.u32 2147483647, %v996_v21  ;;  %vm85_vm8 = vcmp.lt.s32.totalorder %v996_v21, 0 }
  0xa7   :  { %v87_v23 = vshrl.u32 %v86_v22, 23  ;;  %v90_v29 = vand.u32 8388607, %v83_v26  ;;  %vm84_vm9 = vcmp.le.f32.partialorder %v83_v26, 0.7853982 }
  0xa9   :  { %v645_v24 = vadd.s32 4294967169, %v87_v23  ;;  %v91_v48 = vor.u32 8388608, %v90_v29 }
  0xab   :  { %v93_v25 = vadd.s32 1, %v645_v24  ;;  %v131_v62 = vshll.u32 %v91_v48, 8 }
  0xad   :  { %vm94_vm1 = vcmp.gt.s32.totalorder %v93_v25, 0 }
  0xae   :  { %v95_v27 = vsel %vm94_vm1, %v93_v25, 0  ;;  %vm175_vm1 = vweird.f32 %v996_v21 }
  0xaf   :  { %v97_v28 = vand.u32 31, %v95_v27  ;;  %v96_v31 = vshrl.u32 %v95_v27, 5 }
  0xb1   :  { %v98_v30 = vsub.s32 32, %v97_v28  ;;  %v100_v33 = vshll.u32 %v913_v32, %v97_v28  ;;  %v103_v35 = vshll.u32 %v914_v34, %v97_v28  ;;  %v106_v39 = vshll.u32 %v915_v37, %v97_v28 }
  0xb2   :  { %v109_v42 = vshll.u32 %v916_v40, %v97_v28  ;;  %v112_v45 = vshll.u32 %v917_v43, %v97_v28  ;;  %vm115_vm2 = vcmp.lt.s32.totalorder %v96_v31, 1  ;;  %vm118_vm3 = vcmp.lt.s32.totalorder %v96_v31, 4 }
  0xb3   :  { %v101_v36 = vshrl.u32 %v914_v34, %v98_v30  ;;  %v104_v38 = vshrl.u32 %v915_v37, %v98_v30  ;;  %v107_v41 = vshrl.u32 %v916_v40, %v98_v30  ;;  %v110_v44 = vshrl.u32 %v917_v43, %v98_v30 }
  0xb4   :  { %v113_v47 = vshrl.u32 %v918_v46, %v98_v30  ;;  %v99_v57 = vshrl.u32 %v913_v32, %v98_v30  ;;  %vm117_vm4 = vcmp.lt.s32.totalorder %v96_v31, 3  ;;  %vm116_vm5 = vcmp.lt.s32.totalorder %v96_v31, 2 }
  0xb5   :  { %v102_v49 = vor.u32 %v101_v36, %v100_v33  ;;  %v105_v50 = vor.u32 %v104_v38, %v103_v35  ;;  %v108_v51 = vor.u32 %v107_v41, %v106_v39  ;;  %v111_v52 = vor.u32 %v110_v44, %v109_v42 }
  0xb6   :  { %v114_v53 = vor.u32 %v113_v47, %v112_v45 }
  0xb7   :  { %v120_v54 = vsel %vm118_vm3, %v108_v51, 2102212464  ;;  %v123_v55 = vsel %vm115_vm2, %v102_v49, %v105_v50  ;;  %v127_v56 = vsel %vm115_vm2, %v105_v50, %v108_v51  ;;  %v124_v58 = vsel %vm118_vm3, %v111_v52, 920167782 }
  0xb8   :  { %v128_v59 = vsel %vm118_vm3, %v114_v53, 1326507024  ;;  %v125_v60 = vsel %vm117_vm4, %v108_v51, %v124_v58  ;;  %v119_v63 = vsel %vm115_vm2, %v99_v57, %v102_v49  ;;  %v121_v0 = vsel %vm117_vm4, %v105_v50, %v120_v54  ;;  %v803_v58 = vld [vmem:[#allocation7 + $0x38] sm:$0xff]  }
  0xb9   :  { %v129_v61 = vsel %vm117_vm4, %v111_v52, %v128_v59  ;;  %v126_v1 = vsel %vm116_vm5, %v123_v55, %v125_v60  ;;  %v122_v8 = vsel %vm116_vm5, %v119_v63, %v121_v0  ;;  %v804_v59 = vld [vmem:[#allocation7 + $0x30] sm:$0xff]   ;;  %v806_v60 = vld [vmem:[#allocation7 + $0x20] sm:$0xff]   ;;  %v809_v63 = vld [vmem:[#allocation7 + $0x8] sm:$0xff]  }
  0xba   :  { %v130_v2 = vsel %vm116_vm5, %v127_v56, %v129_v61  ;;  %v1005_v6 = vmul.u32.u64.low %v131_v62, %v126_v1  ;;  %v1006_v7 = vmul.u32.u64.high %v131_v62, %v126_v1, %v1005_v6  ;;  %v138_v10 = vmul.u32 %v131_v62, %v122_v8  ;;  %v807_v61 = vld [vmem:[#allocation7 + $0x18] sm:$0xff]   ;;  %v810_v0 = vld [vmem:[#allocation7] sm:$0xff]  }
  0xbb   :  { %v1002_v3 = vmul.u32.u64.low %v131_v62, %v130_v2  ;;  %v1003_v5 = vmul.u32.u64.high %v131_v62, %v130_v2, %v1002_v3  ;;  %v808_v62 = vld [vmem:[#allocation7 + $0x10] sm:$0xff]  }
  0xbc   :  { %v141_v9 = vadd.s32 1, %v1006_v7  ;;  %v669_v3 = vld [vmem:[%s1039_s4] ss:$0 sm:$0xff]  ;;  %s919_s4 = smov [#allocation8]  }
  0xbd   :  { %vm140_vm6 = vc.u32 %v1003_v5, %v1005_v6  ;;  %v139_v23 = vadd.s32 %v1005_v6, %v1003_v5  ;;  %s634_s21 = sshll.u32 %s919_s4, 4  ;;  %s635_s21 = int_to_ptr.vmem [resolvable:$true] %s634_s21 }
  0xbe   :  { %v142_v11 = vsel %vm140_vm6, %v141_v9, %v1006_v7  ;;  %s879_s22 = scalar_lea.vmem %s635_s21, 128  ;;  %p884_p2 = scmp.lt.s32.totalorder %s635_s21, %s635_s21 }
  0xbf   :  { %v143_v12 = vadd.s32 %v142_v11, %v138_v10  ;;  %p880_p1 = scmp.ne.s32.totalorder %s635_s21, %s879_s22  ;;  %p885_p3 = scmp.lt.s32.totalorder %s879_s22, %s879_s22 }
  0xc1   :  { %v144_v13 = vadd.s32 536870912, %v143_v12  ;;  %p886_p4 = por %p885_p3, %p884_p2 }
  0xc3   :  { %v145_v14 = vshrl.u32 %v144_v13, 30  ;;  %p887_p5 = pnand %p886_p4, %p880_p1 }
  0xc5   :  { %v146_v15 = vshll.u32 %v145_v14, 30  ;;  %v169_v37 = vsub.s32 4, %v145_v14 }
  0xc7   :  { %v147_v16 = vsub.s32 %v143_v12, %v146_v15  ;;  %v170_v40 = vsel %vm85_vm8, %v169_v37, %v145_v14 }
  0xc8   :  { %v172_v41 = vsel %vm84_vm9, 0, %v170_v40 }
  0xc9   :  { %v149_v17 = vsub.s32 0, %v147_v16  ;;  %v296_v42 = vadd.s32 3, %v172_v41  ;;  %v176_v44 = vand.u32 3, %v172_v41 }
  0xcb   :  { %v646_v18 = vmin.u32 %v149_v17, %v147_v16  ;;  %v297_v43 = vand.u32 3, %v296_v42  ;;  %vm181_vm11 = vcmp.eq.s32.totalorder %v176_v44, 2  ;;  %vm178_vm13 = vcmp.eq.s32.totalorder %v176_v44, 0 }
  0xcc   :  { %vm177_vm15 = vcmp.lt.s32.totalorder %v176_v44, 2 }
  0xcd   :  { %v151_v19 = vclz %v646_v18  ;;  %vm302_vm10 = vcmp.eq.s32.totalorder %v297_v43, 2  ;;  %vm299_vm12 = vcmp.eq.s32.totalorder %v297_v43, 0  ;;  %vm298_vm14 = vcmp.lt.s32.totalorder %v297_v43, 2  ;;  %v671_v18 = vld [vmem:[%s1041_s6] ss:$0 sm:$0xff] }
  0xcf   :  { %v647_v20 = vadd.s32 4294967294, %v151_v19 }
  0xd1   :  { %vm648_vm7 = vcmp.lt.s32.totalorder %v647_v20, 0 }
  0xd2   :  { %v154_v22 = vsel %vm648_vm7, 0, %v647_v20 }
  0xd3   :  { %v155_v24 = vsub.s32 32, %v154_v22  ;;  %v159_v25 = vsub.s32 4294967266, %v154_v22  ;;  %v156_v27 = vshll.u32 %v147_v16, %v154_v22 }
  0xd5   :  { %v157_v28 = vshrl.u32 %v139_v23, %v155_v24  ;;  %v160_v29 = vadd.s32 127, %v159_v25 }
  0xd7   :  { %v158_v30 = vor.u32 %v157_v28, %v156_v27  ;;  %v161_v31 = vshll.u32 %v160_v29, 23 }
  0xd9   :  { %v162_v32 = vor.u32 4788187, %v161_v31  ;;  %v165_v34 = vcvt.s32.f32 %v158_v30 }
  0xdb   :  { %v163_v33 = vand.u32 2147483647, %v162_v32 }
  0xdd   :  { %v166_v35 = vmul.f32 %v165_v34, %v163_v33 }
  0xdf   :  { %v167_v36 = vxor.u32 2147483648, %v166_v35 }
  0xe1   :  { %v168_v38 = vsel %vm85_vm8, %v167_v36, %v166_v35 }
  0xe2   :  { %v171_v39 = vsel %vm84_vm9, %v996_v21, %v168_v38  ;;  %v805_v21 = vld [vmem:[#allocation7 + $0x28] sm:$0xff]  }
  0xe3   :  { %811 = vcosq.f32 %v171_v39 }
  0xe4   :  { %813 = vsinq.f32 %v171_v39 }
  0xf0   :  { %v812_v45 = vpop.eup %811 }
  0xf1   :  { %v814_v46 = vpop.eup %813  ;;  %v182_v47 = vxor.u32 2147483648, %v812_v45 }
  0xf2   :  { %v179_v48 = vxor.u32 2147483648, %v814_v46 }
  0xf3   :  { %v304_v49 = vsel %vm302_vm10, %v182_v47, %v814_v46  ;;  %v183_v26 = vsel %vm181_vm11, %v182_v47, %v814_v46 }
  0xf4   :  { %v301_v50 = vsel %vm299_vm12, %v812_v45, %v179_v48  ;;  %v180_v51 = vsel %vm178_vm13, %v812_v45, %v179_v48 }
  0xf5   :  { %v305_v52 = vsel %vm298_vm14, %v301_v50, %v304_v49  ;;  %v184_v53 = vsel %vm177_vm15, %v180_v51, %v183_v26 }
  0xf6   :  { %v306_v54 = vsel %vm175_vm1, nan, %v305_v52  ;;  %v185_v55 = vsel %vm175_vm1, nan, %v184_v53 }
  0xf7   :  { %v307_v56 = vpack.c.bf16 %v306_v54, %v306_v54  ;;  %v186_v57 = vpack.c.bf16 %v185_v55, %v185_v55 }
  0xf9   :  { %724 = vmatmul.mubr.bf16.vlgmr.msra.gmra.mxu0 %v307_v56  ;;  %744 = vmatmul.mubr.bf16.vlgmr.msra.gmra.mxu1 %v186_v57 }
  0xfa   :  { %763 = vmatprep.mubr.msk.bf16.mxu0 %vm912_vm0, %v911_v4  ;;  %748 = vmatpush3.bf16.msra.mxu0 %v803_v58 }
  0xfb   :  { %749 = vmatprep.subr.bf16.mxu0 %v911_v4 }
  0xfe   :  { %750 = vmatpush3.bf16.msra.mxu0 %v804_v59 }
  0xff   :  { %751 = vmatprep.subr.bf16.mxu0 %v911_v4 }
 0x102   :  { %752 = vmatpush3.bf16.msra.mxu0 %v805_v21 }
 0x103   :  { %753 = vmatprep.subr.bf16.mxu0 %v911_v4 }
 0x106   :  { %754 = vmatpush3.bf16.msra.mxu0 %v806_v60 }
 0x107   :  { %755 = vmatprep.subr.bf16.mxu0 %v911_v4 }
 0x10a   :  { %756 = vmatpush3.bf16.msra.mxu0 %v807_v61 }
 0x10b   :  { %757 = vmatprep.subr.bf16.mxu0 %v911_v4 }
 0x10e   :  { %758 = vmatpush3.bf16.msra.mxu0 %v808_v62 }
 0x10f   :  { %759 = vmatprep.subr.bf16.mxu0 %v911_v4 }
 0x112   :  { %760 = vmatpush3.bf16.msra.mxu0 %v809_v63 }
 0x113   :  { %761 = vmatprep.subr.bf16.mxu0 %v911_v4 }
 0x116   :  { %762 = vmatpush3.bf16.msra.mxu0 %v810_v0 }
 0x1b9   :  { %v406_v1 = vpop.f32.mrf.mxu0  ;;  %v494_v2 = vpop.f32.mrf.mxu1 }
 0x1ba   :  { %v495_v5 = vadd.f32 %v494_v2, %v406_v1 }
 0x1bb   :  { %v725_v6 = vpop.f32.mrf.mxu0  ;;  %v745_v7 = vpop.f32.mrf.mxu1 }
 0x1bc   :  { %v507_v8 = vadd.f32 %v669_v3, %v495_v5 }
 0x1bd   :  { %v409_v9 = vpop.f32.mrf.mxu0  ;;  %v497_v10 = vpop.f32.mrf.mxu1 }
 0x1be   :  { %v670_v11 = vmul.f32 -1.442695, %v507_v8 }
 0x1bf   :  { %v726_v12 = vpop.f32.mrf.mxu0  ;;  %v746_v13 = vpop.f32.mrf.mxu1 }
 0x1c0   :  { %815 = vpow2.f32 %v670_v11 }
 0x1cd   :  { %v816_v14 = vpop.eup %815 }
 0x1ce   :  { %v511_v4 = vadd.f32 1.0, %v816_v14 }
 0x1d0   :  { %817 = vrcp.f32 %v511_v4 }
 0x1dd   :  { %v818_v15 = vpop.eup %817 }
 0x1de   :  { %v514_v16 = vmul.f32 %v818_v15, %v507_v8 }
 0x1e0   :  { %v515_v17 = vpack.c.bf16 %v514_v16, %v514_v16 }
 0x1e2   :  { %764 = vmatmul.mubr.bf16.vlgmr.msra.gmra.mxu0 %v515_v17 }
 0x2a2   :  { %v621_v19 = vpop.f32.mrf.mxu0 }
 0x2a3   :  { %v622_v20 = vadd.f32 %v671_v18, %v621_v19 }
 0x2a4   :  { %v765_v22 = vpop.f32.mrf.mxu0 }
 0x2a5   :  { %627 = vst [vmem:[#allocation8] sm:$0xff] %v622_v20 }
 0x2a6   :  { %v624_v23 = vpop.f32.mrf.mxu0 }
 0x2a7   :  { %890 = shalt.err (!%p887_p5)
}
 0x2a8   :  { %637 = dma.vmem_to_hbm [thread:$0]  %s635_s21, 128, %s1042_s7, [#allocation4]   ;;  %v766_v24 = vpop.f32.mrf.mxu0 }
 0x2a9   :  { %903 = dma.done.wait [#allocation4], 128  }
 0x2aa   :  { %904 = vsyncadd [#allocation4], 4294967168 }
 0x2ab   :  { %641 = vsyncpa [#allocation3], 1 }
 0x2ac   :  { %642 = vsyncpa [#allocation6], 1 }
 0x2ad   :  { %643 = vsyncpa [#allocation4], 1 }

</bundles_post_ra>
